<compile_context>
chip_gen: v5e
topology: v5e:2x2
jax: 0.10.0
libtpu: 0.0.40
codegen_flags: <defaults>
</compile_context>

<pallas_src>
import jax
import jax.numpy as jnp
from jax import lax
from jax.experimental import pallas as pl
from jax.experimental.pallas import tpu as pltpu

MAX_GRID_SIZE = 30
NUM_COLORS = 10
D_MODEL = 32          # natural CTM width (parameters are stored at this width)
N_TICKS = 8           # CTM internal iterations ("thought" ticks)


def _round_up(n, m):
    return ((n + m - 1) // m) * m


def _cdiv(a, b):
    return (a + b - 1) // b


# --------------------------------------------------------------------------- #
# Kernel
# --------------------------------------------------------------------------- #
def _ctm_grid_kernel(x_ref, w_x_ref, b_drive_ref, w_h_ref, w_c_ref, b_c_ref,
                     o_ref):
    # Fused glue: one exact int -> bf16 cast of the concatenated features.
    x = x_ref[...].astype(jnp.bfloat16)                       # [TM, K_pad]

    # Input projection: one full-depth MXU pass (position scale is folded into
    # w_x rows, b_in + b_h pre-summed into b_drive).
    drive = (jnp.dot(x, w_x_ref[...], preferred_element_type=jnp.float32)
             + b_drive_ref[...])                               # [TM, D] f32

    w_h = w_h_ref[...]                                         # bf16, resident
    h0 = jnp.zeros_like(drive)

    def tick(_, h):
        return jnp.tanh(
            jnp.dot(h.astype(jnp.bfloat16), w_h,
                    preferred_element_type=jnp.float32) + drive)

    # Last-tick hidden state == ctm_out[:, :, -1] of the reference module.
    h = lax.fori_loop(0, N_TICKS, tick, h0, unroll=True)

    # cell_head: Linear(d_model -> num_colors), lane-padded -> unmasked store.
    o_ref[...] = (jnp.dot(h.astype(jnp.bfloat16), w_c_ref[...],
                          preferred_element_type=jnp.float32)
                  + b_c_ref[...])


# --------------------------------------------------------------------------- #
# One-time parameter preparation (hoisted out of the decode loop)
# --------------------------------------------------------------------------- #
def prepare_params(params, Fi, Fo):
    """Pad / fuse / cast parameters once.  Returns the pytree consumed by
    ctm_grid_forward."""
    w_in, b_in, w_h, b_h, w_cell, b_cell = params
    d_in, d_model = w_in.shape
    assert d_in == Fi + Fo + 2

    D = _round_up(max(d_model, NUM_COLORS), 128)      # lane-dense width (128)
    K_pad = _round_up(d_in, 128)                      # 256 for 8x8 grids

    # Fold 1/MAX_GRID_SIZE into the two position rows, fuse all of w_in.
    w_pos = w_in[Fi + Fo:] * (1.0 / MAX_GRID_SIZE)
    w_x = jnp.concatenate([w_in[:Fi + Fo], w_pos], axis=0)
    w_x = jnp.pad(w_x, ((0, K_pad - d_in), (0, D - d_model))).astype(jnp.bfloat16)

    # Pre-summed recurrence drive bias (b_in + b_h), kept f32.
    b_drive = jnp.pad(b_in + b_h, ((0, 0), (0, D - d_model))).astype(jnp.float32)

    w_h_p = jnp.pad(w_h, ((0, D - d_model), (0, D - d_model))).astype(jnp.bfloat16)
    w_c_p = jnp.pad(w_cell, ((0, D - d_model),
                             (0, D - NUM_COLORS))).astype(jnp.bfloat16)
    b_c_p = jnp.pad(b_cell, ((0, 0), (0, D - NUM_COLORS))).astype(jnp.float32)

    return (w_x, b_drive, w_h_p, w_c_p, b_c_p)


# --------------------------------------------------------------------------- #
# Forward
# --------------------------------------------------------------------------- #
@jax.jit
def ctm_grid_forward(input_grid, partial_output_grid, position, prepped):
    """input_grid: [B,H_in,W_in] int, partial_output_grid: [B,H_out,W_out] int,
    position: [B,2] int.  Returns cell_logits [B, NUM_COLORS] f32."""
    w_x, b_drive, w_h_p, w_c_p, b_c_p = prepped
    B, H_in, W_in = input_grid.shape
    _, H_out, W_out = partial_output_grid.shape
    Fi, Fo = H_in * W_in, H_out * W_out
    d_in = Fi + Fo + 2
    K_pad, D = w_x.shape

    # One concatenated int32 feature array (casts + position scale fused into
    # the kernel / the pre-scaled weight rows).
    x_int = jnp.concatenate(
        [input_grid.reshape(B, Fi).astype(jnp.int32),
         partial_output_grid.reshape(B, Fo).astype(jnp.int32),
         position.astype(jnp.int32)], axis=1)                   # [B, d_in]

    # Batch tiling:
    #  * tiny batch  -> one tile (min 8 sublanes)
    #  * 16..512     -> 2 tiles so both v7x TensorCores run (the extra
    #                   ~0.35 us grid step is noise on 1-TC v5e/v6e)
    #  * very large  -> 256-row tiles to amortize per-step overhead
    #                   (VMEM/tile < 2 MiB; no spill risk at this width)
    if B < 16:
        tm, n_tiles = _round_up(B, 8), 1
    elif B <= 512:
        tm, n_tiles = _round_up(_cdiv(B, 2), 8), 2
    else:
        tm = 256
        n_tiles = _cdiv(B, tm)
    b_pad = tm * n_tiles

    x_int = jnp.pad(x_int, ((0, b_pad - B), (0, K_pad - d_in)))

    full_spec = lambda a: pl.BlockSpec(a.shape, lambda i: (0, 0))

    out = pl.pallas_call(
        _ctm_grid_kernel,
        out_shape=jax.ShapeDtypeStruct((b_pad, D), jnp.float32),
        grid=(n_tiles,),
        in_specs=[
            pl.BlockSpec((tm, K_pad), lambda i: (i, 0)),   # batched features
            full_spec(w_x), full_spec(b_drive),
            full_spec(w_h_p), full_spec(w_c_p), full_spec(b_c_p),
        ],
        out_specs=pl.BlockSpec((tm, D), lambda i: (i, 0)),
        compiler_params=pltpu.CompilerParams(
            # batch tiles are independent -> shard across v7x's 2 TensorCores
            dimension_semantics=("parallel",)),
    )(x_int, w_x, b_drive, w_h_p, w_c_p, b_c_p)

    return out[:B, :NUM_COLORS]


# --------------------------------------------------------------------------- #
# Reference (pure JAX, f32) — mirrors the synthetic CTM backbone exactly.
# --------------------------------------------------------------------------- #
def ctm_grid_forward_ref(input_grid, partial_output_grid, position, params):
    w_in, b_in, w_h, b_h, w_cell, b_cell = params
    B = input_grid.shape[0]
    x = jnp.concatenate(
        [input_grid.reshape(B, -1).astype(jnp.float32),
         partial_output_grid.reshape(B, -1).astype(jnp.float32),
         position.astype(jnp.float32) / MAX_GRID_SIZE], axis=1)
    drive = x @ w_in + b_in + b_h
    h = jnp.zeros((B, w_h.shape[0]), jnp.float32)
    for _ in range(N_TICKS):
        h = jnp.tanh(h @ w_h + drive)
    return h @ w_cell + b_cell


def init_params(key, d_in):
    ks = jax.random.split(key, 4)
    w_in = jax.random.normal(ks[0], (d_in, D_MODEL), jnp.float32) * 0.02
    b_in = jnp.zeros((1, D_MODEL), jnp.float32)
    w_h = jax.random.normal(ks[1], (D_MODEL, D_MODEL), jnp.float32) * 0.1
    b_h = jnp.zeros((1, D_MODEL), jnp.float32)
    # cell_head: nn.Linear(d_model, num_colors)
    w_cell = jax.random.normal(ks[2], (D_MODEL, NUM_COLORS), jnp.float32) * 0.1
    b_cell = jax.random.normal(ks[3], (1, NUM_COLORS), jnp.float32) * 0.01
    return (w_in, b_in, w_h, b_h, w_cell, b_cell)


if __name__ == "__main__":
    key = jax.random.PRNGKey(0)
    k_in, k_out, k_pos, k_par = jax.random.split(key, 4)

    B, H_in, W_in = 2, 8, 8
    H_out, W_out = 8, 8

    input_grid = jax.random.randint(k_in, (B, H_in, W_in), 0, NUM_COLORS,
                                    dtype=jnp.int32)
    partial_output_grid = jax.random.randint(k_out, (B, H_out, W_out), 0,
                                             NUM_COLORS, dtype=jnp.int32)
    position = jax.random.randint(k_pos, (B, 2), 0, H_out, dtype=jnp.int32)

    Fi, Fo = H_in * W_in, H_out * W_out
    params = init_params(k_par, Fi + Fo + 2)

    # One-time param prep (hoisted out of the decode loop).
    prepped = prepare_params(params, Fi, Fo)
    prepped = jax.tree_util.tree_map(jax.block_until_ready, prepped)

    logits = jax.block_until_ready(
        ctm_grid_forward(input_grid, partial_output_grid, position, prepped))
    assert logits.shape == (B, NUM_COLORS)
    assert logits.dtype == jnp.float32
    assert bool(jnp.all(jnp.isfinite(logits)))

    # Numerics vs f32 reference (bf16 MXU operands -> loose tolerance).
    ref = ctm_grid_forward_ref(input_grid, partial_output_grid, position, params)
    max_err = float(jnp.max(jnp.abs(logits - ref)))
    assert max_err < 1e-1, f"max abs error vs f32 reference: {max_err}"

    # Batched decode path: many pending cells folded into the batch dim; the
    # kernel runs 2 parallel tiles (one per v7x TensorCore) with weights
    # DMA'd once per call.
    Bb = 256
    kb1, kb2, kb3 = jax.random.split(jax.random.PRNGKey(1), 3)
    big_in = jax.random.randint(kb1, (Bb, H_in, W_in), 0, NUM_COLORS,
                                dtype=jnp.int32)
    big_out = jax.random.randint(kb2, (Bb, H_out, W_out), 0, NUM_COLORS,
                                 dtype=jnp.int32)
    big_pos = jax.random.randint(kb3, (Bb, 2), 0, H_out, dtype=jnp.int32)
    big_logits = jax.block_until_ready(
        ctm_grid_forward(big_in, big_out, big_pos, prepped))
    assert big_logits.shape == (Bb, NUM_COLORS)
    assert big_logits.dtype == jnp.float32
    assert bool(jnp.all(jnp.isfinite(big_logits)))

    print("KERNEL_OK")
</pallas_src>

<mosaic_0001>
module attributes {stable_mosaic.version = 11 : i64} {
  func.func @_ctm_grid_kernel(%arg0: i32, %arg1: memref<8x256xi32, #tpu.memory_space<vmem>>, %arg2: memref<256x128xbf16, #tpu.memory_space<vmem>>, %arg3: memref<1x128xf32, #tpu.memory_space<vmem>>, %arg4: memref<128x128xbf16, #tpu.memory_space<vmem>>, %arg5: memref<128x128xbf16, #tpu.memory_space<vmem>>, %arg6: memref<1x128xf32, #tpu.memory_space<vmem>>, %arg7: memref<8x128xf32, #tpu.memory_space<vmem>>) attributes {dimension_semantics = [#tpu.dimension_semantics<parallel>], iteration_bounds = array<i64: 1>, scalar_prefetch = 0 : i64, scratch_operands = 0 : i64, tpu.core_type = #tpu.core_type<tc>, window_params = [{transform_indices = @transform_0, window_bounds = array<i64: 8, 256>}, {pipeline_mode = #tpu.pipeline_mode<synchronous>, transform_indices = @transform_1, window_bounds = array<i64: 256, 128>}, {pipeline_mode = #tpu.pipeline_mode<synchronous>, transform_indices = @transform_2, window_bounds = array<i64: 1, 128>}, {pipeline_mode = #tpu.pipeline_mode<synchronous>, transform_indices = @transform_3, window_bounds = array<i64: 128, 128>}, {pipeline_mode = #tpu.pipeline_mode<synchronous>, transform_indices = @transform_4, window_bounds = array<i64: 128, 128>}, {pipeline_mode = #tpu.pipeline_mode<synchronous>, transform_indices = @transform_5, window_bounds = array<i64: 1, 128>}, {transform_indices = @transform_6, window_bounds = array<i64: 8, 128>}]} {
    %c0 = arith.constant 0 : index
    %c0_0 = arith.constant 0 : index
    %0 = vector.load %arg1[%c0, %c0_0] : memref<8x256xi32, #tpu.memory_space<vmem>>, vector<8x256xi32>
    %1 = arith.sitofp %0 : vector<8x256xi32> to vector<8x256xbf16>
    %c0_1 = arith.constant 0 : index
    %c0_2 = arith.constant 0 : index
    %2 = vector.load %arg2[%c0_1, %c0_2] : memref<256x128xbf16, #tpu.memory_space<vmem>>, vector<256x128xbf16>
    %cst = arith.constant dense<0.000000e+00> : vector<8x128xf32>
    %3 = tpu.matmul %1, %2, %cst {dimension_numbers = #tpu.dot_dimension_numbers<[1], [0], [0], [1], [0, 0, 1, 1], [], []>} : vector<8x256xbf16>, vector<256x128xbf16>, vector<8x128xf32> -> vector<8x128xf32>
    %c0_3 = arith.constant 0 : index
    %c0_4 = arith.constant 0 : index
    %4 = vector.load %arg3[%c0_3, %c0_4] : memref<1x128xf32, #tpu.memory_space<vmem>>, vector<1x128xf32>
    %5 = vector.broadcast %4 : vector<1x128xf32> to vector<8x128xf32>
    %6 = arith.addf %3, %5 : vector<8x128xf32>
    %c0_5 = arith.constant 0 : index
    %c0_6 = arith.constant 0 : index
    %7 = vector.load %arg4[%c0_5, %c0_6] : memref<128x128xbf16, #tpu.memory_space<vmem>>, vector<128x128xbf16>
    %cst_7 = arith.constant 0.000000e+00 : f32
    %8 = vector.broadcast %cst_7 : f32 to vector<8x128xf32>
    %c0_i32 = arith.constant 0 : i32
    %9 = arith.truncf %8 : vector<8x128xf32> to vector<8x128xbf16>
    %cst_8 = arith.constant dense<0.000000e+00> : vector<8x128xf32>
    %10 = tpu.matmul %9, %7, %cst_8 {dimension_numbers = #tpu.dot_dimension_numbers<[1], [0], [0], [1], [0, 0, 1, 1], [], []>} : vector<8x128xbf16>, vector<128x128xbf16>, vector<8x128xf32> -> vector<8x128xf32>
    %11 = arith.addf %10, %6 : vector<8x128xf32>
    %12 = math.tanh %11 : vector<8x128xf32>
    %c1_i32 = arith.constant 1 : i32
    %13 = arith.truncf %12 : vector<8x128xf32> to vector<8x128xbf16>
    %cst_9 = arith.constant dense<0.000000e+00> : vector<8x128xf32>
    %14 = tpu.matmul %13, %7, %cst_9 {dimension_numbers = #tpu.dot_dimension_numbers<[1], [0], [0], [1], [0, 0, 1, 1], [], []>} : vector<8x128xbf16>, vector<128x128xbf16>, vector<8x128xf32> -> vector<8x128xf32>
    %15 = arith.addf %14, %6 : vector<8x128xf32>
    %16 = math.tanh %15 : vector<8x128xf32>
    %c2_i32 = arith.constant 2 : i32
    %17 = arith.truncf %16 : vector<8x128xf32> to vector<8x128xbf16>
    %cst_10 = arith.constant dense<0.000000e+00> : vector<8x128xf32>
    %18 = tpu.matmul %17, %7, %cst_10 {dimension_numbers = #tpu.dot_dimension_numbers<[1], [0], [0], [1], [0, 0, 1, 1], [], []>} : vector<8x128xbf16>, vector<128x128xbf16>, vector<8x128xf32> -> vector<8x128xf32>
    %19 = arith.addf %18, %6 : vector<8x128xf32>
    %20 = math.tanh %19 : vector<8x128xf32>
    %c3_i32 = arith.constant 3 : i32
    %21 = arith.truncf %20 : vector<8x128xf32> to vector<8x128xbf16>
    %cst_11 = arith.constant dense<0.000000e+00> : vector<8x128xf32>
    %22 = tpu.matmul %21, %7, %cst_11 {dimension_numbers = #tpu.dot_dimension_numbers<[1], [0], [0], [1], [0, 0, 1, 1], [], []>} : vector<8x128xbf16>, vector<128x128xbf16>, vector<8x128xf32> -> vector<8x128xf32>
    %23 = arith.addf %22, %6 : vector<8x128xf32>
    %24 = math.tanh %23 : vector<8x128xf32>
    %c4_i32 = arith.constant 4 : i32
    %25 = arith.truncf %24 : vector<8x128xf32> to vector<8x128xbf16>
    %cst_12 = arith.constant dense<0.000000e+00> : vector<8x128xf32>
    %26 = tpu.matmul %25, %7, %cst_12 {dimension_numbers = #tpu.dot_dimension_numbers<[1], [0], [0], [1], [0, 0, 1, 1], [], []>} : vector<8x128xbf16>, vector<128x128xbf16>, vector<8x128xf32> -> vector<8x128xf32>
    %27 = arith.addf %26, %6 : vector<8x128xf32>
    %28 = math.tanh %27 : vector<8x128xf32>
    %c5_i32 = arith.constant 5 : i32
    %29 = arith.truncf %28 : vector<8x128xf32> to vector<8x128xbf16>
    %cst_13 = arith.constant dense<0.000000e+00> : vector<8x128xf32>
    %30 = tpu.matmul %29, %7, %cst_13 {dimension_numbers = #tpu.dot_dimension_numbers<[1], [0], [0], [1], [0, 0, 1, 1], [], []>} : vector<8x128xbf16>, vector<128x128xbf16>, vector<8x128xf32> -> vector<8x128xf32>
    %31 = arith.addf %30, %6 : vector<8x128xf32>
    %32 = math.tanh %31 : vector<8x128xf32>
    %c6_i32 = arith.constant 6 : i32
    %33 = arith.truncf %32 : vector<8x128xf32> to vector<8x128xbf16>
    %cst_14 = arith.constant dense<0.000000e+00> : vector<8x128xf32>
    %34 = tpu.matmul %33, %7, %cst_14 {dimension_numbers = #tpu.dot_dimension_numbers<[1], [0], [0], [1], [0, 0, 1, 1], [], []>} : vector<8x128xbf16>, vector<128x128xbf16>, vector<8x128xf32> -> vector<8x128xf32>
    %35 = arith.addf %34, %6 : vector<8x128xf32>
    %36 = math.tanh %35 : vector<8x128xf32>
    %c7_i32 = arith.constant 7 : i32
    %37 = arith.truncf %36 : vector<8x128xf32> to vector<8x128xbf16>
    %cst_15 = arith.constant dense<0.000000e+00> : vector<8x128xf32>
    %38 = tpu.matmul %37, %7, %cst_15 {dimension_numbers = #tpu.dot_dimension_numbers<[1], [0], [0], [1], [0, 0, 1, 1], [], []>} : vector<8x128xbf16>, vector<128x128xbf16>, vector<8x128xf32> -> vector<8x128xf32>
    %39 = arith.addf %38, %6 : vector<8x128xf32>
    %40 = math.tanh %39 : vector<8x128xf32>
    %41 = arith.truncf %40 : vector<8x128xf32> to vector<8x128xbf16>
    %c0_16 = arith.constant 0 : index
    %c0_17 = arith.constant 0 : index
    %42 = vector.load %arg5[%c0_16, %c0_17] : memref<128x128xbf16, #tpu.memory_space<vmem>>, vector<128x128xbf16>
    %cst_18 = arith.constant dense<0.000000e+00> : vector<8x128xf32>
    %43 = tpu.matmul %41, %42, %cst_18 {dimension_numbers = #tpu.dot_dimension_numbers<[1], [0], [0], [1], [0, 0, 1, 1], [], []>} : vector<8x128xbf16>, vector<128x128xbf16>, vector<8x128xf32> -> vector<8x128xf32>
    %c0_19 = arith.constant 0 : index
    %c0_20 = arith.constant 0 : index
    %44 = vector.load %arg6[%c0_19, %c0_20] : memref<1x128xf32, #tpu.memory_space<vmem>>, vector<1x128xf32>
    %45 = vector.broadcast %44 : vector<1x128xf32> to vector<8x128xf32>
    %46 = arith.addf %43, %45 : vector<8x128xf32>
    %c0_21 = arith.constant 0 : index
    %c0_22 = arith.constant 0 : index
    %47 = vector.load %arg7[%c0_21, %c0_22] : memref<8x128xf32, #tpu.memory_space<vmem>>, vector<8x128xf32>
    tpu.vector_store %arg7[%c0_21, %c0_22], %46 {strides = array<i32>} : memref<8x128xf32, #tpu.memory_space<vmem>>, vector<8x128xf32>,
    return
  }
  func.func @transform_0(%arg0: i32) -> (i32, i32) {
    %c0_i32 = arith.constant 0 : i32
    %c0_i32_0 = arith.constant 0 : i32
    return %arg0, %c0_i32 : i32, i32
  }
  func.func @transform_1(%arg0: i32) -> (i32, i32) {
    %c0_i32 = arith.constant 0 : i32
    %c0_i32_0 = arith.constant 0 : i32
    %c0_i32_1 = arith.constant 0 : i32
    return %c0_i32, %c0_i32_0 : i32, i32
  }
  func.func @transform_2(%arg0: i32) -> (i32, i32) {
    %c0_i32 = arith.constant 0 : i32
    %c0_i32_0 = arith.constant 0 : i32
    %c0_i32_1 = arith.constant 0 : i32
    return %c0_i32, %c0_i32_0 : i32, i32
  }
  func.func @transform_3(%arg0: i32) -> (i32, i32) {
    %c0_i32 = arith.constant 0 : i32
    %c0_i32_0 = arith.constant 0 : i32
    %c0_i32_1 = arith.constant 0 : i32
    return %c0_i32, %c0_i32_0 : i32, i32
  }
  func.func @transform_4(%arg0: i32) -> (i32, i32) {
    %c0_i32 = arith.constant 0 : i32
    %c0_i32_0 = arith.constant 0 : i32
    %c0_i32_1 = arith.constant 0 : i32
    return %c0_i32, %c0_i32_0 : i32, i32
  }
  func.func @transform_5(%arg0: i32) -> (i32, i32) {
    %c0_i32 = arith.constant 0 : i32
    %c0_i32_0 = arith.constant 0 : i32
    %c0_i32_1 = arith.constant 0 : i32
    return %c0_i32, %c0_i32_0 : i32, i32
  }
  func.func @transform_6(%arg0: i32) -> (i32, i32) {
    %c0_i32 = arith.constant 0 : i32
    %c0_i32_0 = arith.constant 0 : i32
    return %arg0, %c0_i32 : i32, i32
  }
}

</mosaic_0001>

<bundles_post_ra>
// kernel: ctm_grid_forward.1
= control target key start
LH: loop header
LB: loop body
LE: loop exit
PB: predicated region body
PF: predicated region fallthrough
CT: control target
= control target key end

     0   :  { %11 = vsyncpa [#allocation3], 0  ;;  %s912_s0 = inlined_call_operand.vmem [shape: s32[8,256], index: 0, kind: input, shape index: {}]   ;;  %s913_s1 = inlined_call_operand.hbm [shape: bf16[256,128], index: 1, kind: input, shape index: {}]   ;;  %s914_s2 = inlined_call_operand.vmem [shape: f32[1,128], index: 2, kind: input, shape index: {}]   ;;  %s915_s3 = inlined_call_operand.hbm [shape: bf16[128,128], index: 3, kind: input, shape index: {}]   ;;  %s916_s4 = inlined_call_operand.hbm [shape: bf16[128,128], index: 4, kind: input, shape index: {}]   ;;  %s917_s5 = inlined_call_operand.vmem [shape: f32[1,128], index: 5, kind: input, shape index: {}]   ;;  %s918_s6 = inlined_call_operand.vmem [shape: f32[8,128], index: 6, kind: output, shape index: {}]  }
   0x1   :  { %12 = vsyncpa [#allocation5], 0  ;;  %s34_s23 = sshll.u32 %s915_s3, 4  ;;  %s767_s24 = smov [#allocation4]   ;;  %s35_s23 = int_to_ptr.hbm [resolvable:$true] %s34_s23 }
   0x2   :  { %s36_s25 = sshll.u32 %s767_s24, 4  ;;  %s19_s28 = sshll.u32 %s913_s1, 4  ;;  %s37_s25 = int_to_ptr.vmem [resolvable:$true] %s36_s25  ;;  %s20_s28 = int_to_ptr.hbm [resolvable:$true] %s19_s28 }
   0x3   :  { %s768_s29 = smov 64   ;;  %s769_s30 = smov 4  }
   0x4   :  { %42 = dma.hbm_to_vmem [thread:$0]  %s35_s23, 1024, %s37_s25, [#allocation5], %s768_s29, %s768_s29, %s769_s30  }
   0x5   :  { %s770_s7 = smov [#allocation2]   ;;  %s47_s11 = sshll.u32 %s916_s4, 4  ;;  %s48_s11 = int_to_ptr.hbm [resolvable:$true] %s47_s11 }
   0x6   :  { %s21_s8 = sshll.u32 %s770_s7, 4  ;;  %s771_s3 = smov [#allocation6]   ;;  %s22_s8 = int_to_ptr.vmem [resolvable:$true] %s21_s8 }
   0x7   :  { %27 = dma.hbm_to_vmem [thread:$0]  %s20_s28, 2048, %s22_s8, [#allocation3], %s768_s29, %s768_s29, %s769_s30  }
   0x8   :  { %s49_s12 = sshll.u32 %s771_s3, 4  ;;  %s50_s12 = int_to_ptr.vmem [resolvable:$true] %s49_s12 }
   0x9   :  { %55 = dma.hbm_to_vmem [thread:$0]  %s48_s11, 1024, %s50_s12, [#allocation5], %s768_s29, %s768_s29, %s769_s30  }
   0xa   :  { %763 = dma.done.wait [#allocation3], 2048  }
   0xb   :  { %764 = vsyncadd [#allocation3], 4294965248 }
   0xc   :  { %765 = dma.done.wait [#allocation5], 2048  }
   0xd   :  { %766 = vsyncadd [#allocation5], 4294965248  ;;  %v642_v0 = vld [vmem:[#allocation2 + $0x38] sm:$0xff]  ;;  %v641_v3 = vld [vmem:[#allocation2 + $0x30] sm:$0xff]  ;;  %v772_v30 = vmov 0  }
   0xe   :  { %v650_v1 = vld [vmem:[#allocation2 + $0x78] sm:$0xff]  ;;  %209 = vmatpush.bf16.msra.mxu0 %v642_v0  ;;  %v649_v4 = vld [vmem:[#allocation2 + $0x70] sm:$0xff]  ;;  %v640_v6 = vld [vmem:[#allocation2 + $0x28] sm:$0xff] }
   0xf   :  { %v817_v2 = vld [vmem:[#allocation4 + $0x38] sm:$0xff]  ;;  %222 = vmatpush.bf16.msra.mxu1 %v650_v1  ;;  %v820_v5 = vld [vmem:[#allocation4 + $0x30] sm:$0xff]  ;;  %v648_v7 = vld [vmem:[#allocation2 + $0x68] sm:$0xff] }
  0x10   :  { %299 = vmatpush.bf16.msra.mxu2 %v817_v2  ;;  %314 = vmatpush.bf16.msra.mxu3 %v817_v2  ;;  %v824_v8 = vld [vmem:[#allocation4 + $0x28] sm:$0xff]  ;;  %v639_v9 = vld [vmem:[#allocation2 + $0x20] sm:$0xff]  ;;  %v638_v12 = vld [vmem:[#allocation2 + $0x18] sm:$0xff] }
  0x11   :  { %v647_v10 = vld [vmem:[#allocation2 + $0x60] sm:$0xff]  ;;  %v646_v13 = vld [vmem:[#allocation2 + $0x58] sm:$0xff]  ;;  %v637_v15 = vld [vmem:[#allocation2 + $0x10] sm:$0xff] }
  0x12   :  { %210 = vmatpush.bf16.msra.mxu0 %v641_v3  ;;  %v828_v11 = vld [vmem:[#allocation4 + $0x20] sm:$0xff]  ;;  %v832_v14 = vld [vmem:[#allocation4 + $0x18] sm:$0xff]  ;;  %v645_v16 = vld [vmem:[#allocation2 + $0x50] sm:$0xff] }
  0x13   :  { %223 = vmatpush.bf16.msra.mxu1 %v649_v4  ;;  %v836_v17 = vld [vmem:[#allocation4 + $0x10] sm:$0xff]  ;;  %v636_v18 = vld [vmem:[#allocation2 + $0x8] sm:$0xff]  ;;  %v71_v20 = vld [vmem:[%s912_s0] sm:$0xff] }
  0x14   :  { %300 = vmatpush.bf16.msra.mxu2 %v820_v5  ;;  %315 = vmatpush.bf16.msra.mxu3 %v820_v5  ;;  %v644_v19 = vld [vmem:[#allocation2 + $0x48] sm:$0xff]  ;;  %v73_v23 = vcvt.s32.f32 %v71_v20  ;;  %v635_v25 = vld [vmem:[#allocation2] sm:$0xff]  ;;  %v666_v4 = vld [vmem:[#allocation6 + $0x38] sm:$0xff] }
  0x15   :  { %v72_v21 = vld [vmem:[%s912_s0 + $0x8] sm:$0xff]  ;;  %v643_v26 = vld [vmem:[#allocation2 + $0x40] sm:$0xff] }
  0x16   :  { %211 = vmatpush.bf16.msra.mxu0 %v640_v6  ;;  %v846_v22 = vld [vmem:[#allocation4 + $0x8] sm:$0xff]  ;;  %v74_v24 = vcvt.s32.f32 %v72_v21  ;;  %v651_v27 = vld [vmem:[#allocation4] sm:$0xff]  ;;  %v75_v28 = vpack.c.bf16 %v73_v23, %v73_v23 }
  0x17   :  { %224 = vmatpush.bf16.msra.mxu1 %v648_v7  ;;  %v673_v31 = vld [vmem:[%s914_s2] ss:$0 sm:$0xff]  ;;  %v664_v6 = vld [vmem:[#allocation6 + $0x28] sm:$0xff] }
  0x18   :  { %301 = vmatpush.bf16.msra.mxu2 %v824_v8  ;;  %316 = vmatpush.bf16.msra.mxu3 %v824_v8  ;;  %v76_v29 = vpack.c.bf16 %v74_v24, %v74_v24  ;;  %v663_v7 = vld [vmem:[#allocation6 + $0x20] sm:$0xff] }
  0x1a   :  { %212 = vmatpush.bf16.msra.mxu0 %v639_v9 }
  0x1b   :  { %225 = vmatpush.bf16.msra.mxu1 %v647_v10 }
  0x1c   :  { %302 = vmatpush.bf16.msra.mxu2 %v828_v11  ;;  %317 = vmatpush.bf16.msra.mxu3 %v828_v11 }
  0x1e   :  { %213 = vmatpush.bf16.msra.mxu0 %v638_v12 }
  0x1f   :  { %226 = vmatpush.bf16.msra.mxu1 %v646_v13 }
  0x20   :  { %303 = vmatpush.bf16.msra.mxu2 %v832_v14  ;;  %318 = vmatpush.bf16.msra.mxu3 %v832_v14 }
  0x22   :  { %214 = vmatpush.bf16.msra.mxu0 %v637_v15  ;;  %v660_v15 = vld [vmem:[#allocation6 + $0x8] sm:$0xff] }
  0x23   :  { %227 = vmatpush.bf16.msra.mxu1 %v645_v16  ;;  %v659_v16 = vld [vmem:[#allocation6] sm:$0xff] }
  0x24   :  { %304 = vmatpush.bf16.msra.mxu2 %v836_v17  ;;  %319 = vmatpush.bf16.msra.mxu3 %v836_v17 }
  0x26   :  { %215 = vmatpush.bf16.msra.mxu0 %v636_v18 }
  0x27   :  { %228 = vmatpush.bf16.msra.mxu1 %v644_v19 }
  0x28   :  { %305 = vmatpush.bf16.msra.mxu2 %v846_v22  ;;  %320 = vmatpush.bf16.msra.mxu3 %v846_v22 }
  0x2a   :  { %216 = vmatpush.bf16.msra.mxu0 %v635_v25 }
  0x2b   :  { %229 = vmatpush.bf16.msra.mxu1 %v643_v26 }
  0x2c   :  { %306 = vmatpush.bf16.msra.mxu2 %v651_v27  ;;  %321 = vmatpush.bf16.msra.mxu3 %v651_v27 }
  0x2d   :  { %217 = vmatmul.bf16.vlgmr.msra.gmra.mxu0 %v75_v28 }
  0x2e   :  { %329 = vmatpush.bf16.msrb.mxu0 %v817_v2  ;;  %230 = vmatmul.bf16.vlgmr.msra.gmra.mxu1 %v76_v29 }
  0x2f   :  { %344 = vmatpush.bf16.msrb.mxu1 %v817_v2  ;;  %307 = vmatmul.bf16.vlgmr.msra.gmra.mxu2 %v772_v30 }
  0x30   :  { %374 = vmatpush.bf16.msrb.mxu3 %v817_v2  ;;  %359 = vmatpush.bf16.msrb.mxu2 %v817_v2 }
  0x32   :  { %330 = vmatpush.bf16.msrb.mxu0 %v820_v5 }
  0x33   :  { %345 = vmatpush.bf16.msrb.mxu1 %v820_v5 }
  0x34   :  { %375 = vmatpush.bf16.msrb.mxu3 %v820_v5  ;;  %360 = vmatpush.bf16.msrb.mxu2 %v820_v5 }
  0x36   :  { %331 = vmatpush.bf16.msrb.mxu0 %v824_v8 }
  0x37   :  { %346 = vmatpush.bf16.msrb.mxu1 %v824_v8 }
  0x38   :  { %376 = vmatpush.bf16.msrb.mxu3 %v824_v8  ;;  %361 = vmatpush.bf16.msrb.mxu2 %v824_v8 }
  0x3a   :  { %332 = vmatpush.bf16.msrb.mxu0 %v828_v11 }
  0x3b   :  { %347 = vmatpush.bf16.msrb.mxu1 %v828_v11 }
  0x3c   :  { %377 = vmatpush.bf16.msrb.mxu3 %v828_v11  ;;  %362 = vmatpush.bf16.msrb.mxu2 %v828_v11 }
  0x3e   :  { %333 = vmatpush.bf16.msrb.mxu0 %v832_v14 }
  0x3f   :  { %348 = vmatpush.bf16.msrb.mxu1 %v832_v14 }
  0x40   :  { %378 = vmatpush.bf16.msrb.mxu3 %v832_v14  ;;  %363 = vmatpush.bf16.msrb.mxu2 %v832_v14 }
  0x42   :  { %334 = vmatpush.bf16.msrb.mxu0 %v836_v17 }
  0x43   :  { %349 = vmatpush.bf16.msrb.mxu1 %v836_v17 }
  0x44   :  { %379 = vmatpush.bf16.msrb.mxu3 %v836_v17  ;;  %364 = vmatpush.bf16.msrb.mxu2 %v836_v17 }
  0x46   :  { %335 = vmatpush.bf16.msrb.mxu0 %v846_v22 }
  0x47   :  { %350 = vmatpush.bf16.msrb.mxu1 %v846_v22 }
  0x48   :  { %380 = vmatpush.bf16.msrb.mxu3 %v846_v22  ;;  %365 = vmatpush.bf16.msrb.mxu2 %v846_v22 }
  0x4a   :  { %336 = vmatpush.bf16.msrb.mxu0 %v651_v27 }
  0x4b   :  { %351 = vmatpush.bf16.msrb.mxu1 %v651_v27 }
  0x4c   :  { %381 = vmatpush.bf16.msrb.mxu3 %v651_v27  ;;  %366 = vmatpush.bf16.msrb.mxu2 %v651_v27 }
  0x4e   :  { %389 = vmatpush.bf16.msra.mxu0 %v817_v2 }
  0x4f   :  { %404 = vmatpush.bf16.msra.mxu1 %v817_v2 }
  0x50   :  { %487 = vmatpush.bf16.msra.mxu2 %v666_v4 }
  0x52   :  { %390 = vmatpush.bf16.msra.mxu0 %v820_v5 }
  0x53   :  { %405 = vmatpush.bf16.msra.mxu1 %v820_v5  ;;  %v665_v5 = vld [vmem:[#allocation6 + $0x30] sm:$0xff] }
  0x54   :  { %488 = vmatpush.bf16.msra.mxu2 %v665_v5 }
  0x56   :  { %391 = vmatpush.bf16.msra.mxu0 %v824_v8 }
  0x57   :  { %406 = vmatpush.bf16.msra.mxu1 %v824_v8  ;;  %v662_v8 = vld [vmem:[#allocation6 + $0x18] sm:$0xff] }
  0x58   :  { %489 = vmatpush.bf16.msra.mxu2 %v664_v6 }
  0x5a   :  { %392 = vmatpush.bf16.msra.mxu0 %v828_v11 }
  0x5b   :  { %407 = vmatpush.bf16.msra.mxu1 %v828_v11 }
  0x5c   :  { %490 = vmatpush.bf16.msra.mxu2 %v663_v7 }
  0x5e   :  { %393 = vmatpush.bf16.msra.mxu0 %v832_v14 }
  0x5f   :  { %408 = vmatpush.bf16.msra.mxu1 %v832_v14  ;;  %v661_v14 = vld [vmem:[#allocation6 + $0x10] sm:$0xff] }
  0x60   :  { %491 = vmatpush.bf16.msra.mxu2 %v662_v8 }
  0x62   :  { %394 = vmatpush.bf16.msra.mxu0 %v836_v17 }
  0x63   :  { %409 = vmatpush.bf16.msra.mxu1 %v836_v17 }
  0x64   :  { %492 = vmatpush.bf16.msra.mxu2 %v661_v14 }
  0x66   :  { %395 = vmatpush.bf16.msra.mxu0 %v846_v22 }
  0x67   :  { %410 = vmatpush.bf16.msra.mxu1 %v846_v22  ;;  %v674_v22 = vld [vmem:[%s917_s5] ss:$0 sm:$0xff] }
  0x68   :  { %493 = vmatpush.bf16.msra.mxu2 %v660_v15 }
  0x6a   :  { %396 = vmatpush.bf16.msra.mxu0 %v651_v27 }
  0x6b   :  { %411 = vmatpush.bf16.msra.mxu1 %v651_v27 }
  0x6c   :  { %494 = vmatpush.bf16.msra.mxu2 %v659_v16 }
  0xaa   :  { %v218_v32 = vpop.f32.mrf.mxu0 }
  0xab   :  { %v231_v33 = vpop.f32.mrf.mxu1  ;;  %v219_v34 = vadd.f32 %v673_v31, %v218_v32 }
  0xad   :  { %v896_v35 = vadd.f32 %v231_v33, %v219_v34 }
  0xb2   :  { %v308_v36 = vpop.f32.mrf.mxu2  ;;  %v220_v38 = vpop.f32.mrf.mxu0 }
  0xb3   :  { %v309_v37 = vadd.f32 %v308_v36, %v896_v35  ;;  %v233_v39 = vpop.f32.mrf.mxu1 }
  0xb5   :  { %675 = vtanh.f32 %v309_v37 }
  0xba   :  { %v310_v40 = vpop.f32.mrf.mxu2 }
  0xbb   :  { %v676_v41 = vpop.eup %675 }
  0xbc   :  { %v313_v42 = vpack.c.bf16 %v676_v41, %v676_v41 }
  0xbe   :  { %322 = vmatmul.bf16.vlgmr.msra.gmra.mxu3 %v313_v42 }
 0x141   :  { %v323_v43 = vpop.f32.mrf.mxu3 }
 0x142   :  { %v324_v44 = vadd.f32 %v323_v43, %v896_v35 }
 0x144   :  { %677 = vtanh.f32 %v324_v44 }
 0x149   :  { %v325_v45 = vpop.f32.mrf.mxu3 }
 0x14a   :  { %v678_v46 = vpop.eup %677 }
 0x14b   :  { %v328_v47 = vpack.c.bf16 %v678_v46, %v678_v46 }
 0x14d   :  { %337 = vmatmul.bf16.vlgmr.msrb.gmra.mxu0 %v328_v47 }
 0x1ca   :  { %v338_v48 = vpop.f32.mrf.mxu0 }
 0x1cb   :  { %v339_v49 = vadd.f32 %v338_v48, %v896_v35 }
 0x1cd   :  { %679 = vtanh.f32 %v339_v49 }
 0x1d2   :  { %v340_v50 = vpop.f32.mrf.mxu0 }
 0x1d3   :  { %v680_v51 = vpop.eup %679 }
 0x1d4   :  { %v343_v52 = vpack.c.bf16 %v680_v51, %v680_v51 }
 0x1d6   :  { %352 = vmatmul.bf16.vlgmr.msrb.gmra.mxu1 %v343_v52 }
 0x253   :  { %v353_v53 = vpop.f32.mrf.mxu1 }
 0x254   :  { %v354_v54 = vadd.f32 %v353_v53, %v896_v35 }
 0x256   :  { %681 = vtanh.f32 %v354_v54 }
 0x25b   :  { %v355_v55 = vpop.f32.mrf.mxu1 }
 0x25c   :  { %v682_v56 = vpop.eup %681 }
 0x25d   :  { %v358_v57 = vpack.c.bf16 %v682_v56, %v682_v56 }
 0x25f   :  { %367 = vmatmul.bf16.vlgmr.msrb.gmra.mxu2 %v358_v57 }
 0x2e2   :  { %v368_v58 = vpop.f32.mrf.mxu2 }
 0x2e3   :  { %v369_v59 = vadd.f32 %v368_v58, %v896_v35 }
 0x2e5   :  { %683 = vtanh.f32 %v369_v59 }
 0x2ea   :  { %v370_v60 = vpop.f32.mrf.mxu2 }
 0x2eb   :  { %v684_v61 = vpop.eup %683 }
 0x2ec   :  { %v373_v62 = vpack.c.bf16 %v684_v61, %v684_v61 }
 0x2ee   :  { %382 = vmatmul.bf16.vlgmr.msrb.gmra.mxu3 %v373_v62 }
 0x371   :  { %v383_v63 = vpop.f32.mrf.mxu3 }
 0x372   :  { %v384_v0 = vadd.f32 %v383_v63, %v896_v35 }
 0x374   :  { %685 = vtanh.f32 %v384_v0 }
 0x379   :  { %v385_v1 = vpop.f32.mrf.mxu3 }
 0x37a   :  { %v686_v2 = vpop.eup %685 }
 0x37b   :  { %v388_v3 = vpack.c.bf16 %v686_v2, %v686_v2 }
 0x37d   :  { %397 = vmatmul.bf16.vlgmr.msra.gmra.mxu0 %v388_v3 }
 0x3fa   :  { %v398_v9 = vpop.f32.mrf.mxu0 }
 0x3fb   :  { %v399_v10 = vadd.f32 %v398_v9, %v896_v35 }
 0x3fd   :  { %687 = vtanh.f32 %v399_v10 }
 0x402   :  { %v400_v11 = vpop.f32.mrf.mxu0 }
 0x403   :  { %v688_v12 = vpop.eup %687 }
 0x404   :  { %v403_v13 = vpack.c.bf16 %v688_v12, %v688_v12 }
 0x406   :  { %412 = vmatmul.bf16.vlgmr.msra.gmra.mxu1 %v403_v13 }
 0x483   :  { %v413_v17 = vpop.f32.mrf.mxu1 }
 0x484   :  { %v414_v18 = vadd.f32 %v413_v17, %v896_v35 }
 0x486   :  { %689 = vtanh.f32 %v414_v18 }
 0x48b   :  { %v415_v19 = vpop.f32.mrf.mxu1 }
 0x48c   :  { %v690_v20 = vpop.eup %689 }
 0x48d   :  { %v418_v21 = vpack.c.bf16 %v690_v20, %v690_v20 }
 0x48f   :  { %495 = vmatmul.bf16.vlgmr.msra.gmra.mxu2 %v418_v21 }
 0x512   :  { %v496_v23 = vpop.f32.mrf.mxu2 }
 0x513   :  { %v497_v24 = vadd.f32 %v674_v22, %v496_v23 }
 0x515   :  { %500 = vst [vmem:[%s918_s6] sm:$0xff] %v497_v24 }
 0x51a   :  { %v498_v25 = vpop.f32.mrf.mxu2 }
 0x51b   :  { %505 = vsyncpa [#allocation3], 1 }
 0x51c   :  { %506 = vsyncpa [#allocation5], 1 }

</bundles_post_ra>
